<compile_context>
chip_gen: v7x
topology: tpu7x:2x2x1
jax: 0.10.0
libtpu: 0.0.40
codegen_flags: <defaults>
</compile_context>

<pallas_src>
import jax
import jax.numpy as jnp
from jax.experimental import pallas as pl
from jax.experimental.pallas import tpu as pltpu

# Bias for padded class columns: exp(-1e30 - max) underflows to exactly 0 in f32,
# so padded columns contribute nothing to the softmax sum and never win argmax.
# (Depends on the logits/accumulator staying f32 -- they do.)
_NEG_BIG = -1e30


def _round_up(x, m):
    return (x + m - 1) // m * m


def _cdiv(a, b):
    return -(-a // b)


def _vmem_budget_bytes():
    """~75% of physical VMEM (=> ~48 MiB on v7x, ~96 MiB on v5e/v6e)."""
    cap = 64 * 1024 * 1024  # conservative default (v7x per-core VMEM)
    try:
        info = pltpu.get_tpu_info()
        cap = int(getattr(info, "vmem_capacity_bytes", cap))
    except Exception:
        pass
    return (cap * 3) // 4


def _largest_dividing_tile(d, max_tk):
    """Largest multiple of 128 that divides d, capped at max_tk (0 if none)."""
    best, t = 0, 128
    while t <= min(d, max_tk):
        if d % t == 0:
            best = t
        t += 128
    return best


# ----------------------------------------------------------------------------
# Kernels
# ----------------------------------------------------------------------------
def _predict_epilogue(logits, slab_ref):
    """logits: (tm, n_pad) f32.  Pack [argmax, max softmax prob] into one
    lane-dense (tm, 128) f32 slab: col 0 = class index, col 1 = probability."""
    max_logit = jnp.max(logits, axis=1, keepdims=True)                    # (tm, 1)
    denom = jnp.sum(jnp.exp(logits - max_logit), axis=1, keepdims=True)   # (tm, 1)
    prob = 1.0 / denom        # max softmax prob == 1 / sum(exp(l - max)); exact
    n_pad = logits.shape[1]
    idx = jax.lax.broadcasted_iota(jnp.int32, logits.shape, dimension=1)
    cand = jnp.where(logits == max_logit, idx, jnp.int32(n_pad))
    pred = jnp.min(cand, axis=1, keepdims=True).astype(jnp.float32)       # first argmax
    lane = jax.lax.broadcasted_iota(jnp.int32, slab_ref.shape, dimension=1)
    slab_ref[...] = jnp.where(lane == 0, pred, jnp.where(lane == 1, prob, 0.0))


def _resident_kernel(x_ref, w_ref, b_ref, slab_ref):
    # x: (tm, D) input dtype, w: (D, n_pad) bf16 (VMEM-resident), b: (1, n_pad) f32
    logits = jnp.dot(x_ref[...].astype(w_ref.dtype), w_ref[...],
                     preferred_element_type=jnp.float32) + b_ref[...]
    _predict_epilogue(logits, slab_ref)


def _resident_kernel_with_logits(x_ref, w_ref, b_ref, slab_ref, logits_ref):
    logits = jnp.dot(x_ref[...].astype(w_ref.dtype), w_ref[...],
                     preferred_element_type=jnp.float32) + b_ref[...]
    logits_ref[...] = logits
    _predict_epilogue(logits, slab_ref)


def _ktiled_kernel(x_ref, w_ref, b_ref, slab_ref, logits_ref):
    # grid = (batch tiles, K tiles); the f32 logits output block is resident
    # across the K ("arbitrary") axis and doubles as the accumulator.
    k = pl.program_id(1)

    @pl.when(k == 0)
    def _():
        logits_ref[...] = jnp.broadcast_to(b_ref[...], logits_ref.shape)

    logits_ref[...] += jnp.dot(x_ref[...].astype(w_ref.dtype), w_ref[...],
                               preferred_element_type=jnp.float32)

    @pl.when(k == pl.num_programs(1) - 1)
    def _():
        _predict_epilogue(logits_ref[...], slab_ref)


# ----------------------------------------------------------------------------
# Parameter prep: pre-transpose + pad the nn.Linear weight/bias ONCE.
#   w: (num_classes, in_features) (PyTorch layout),  b: (num_classes,)
# ----------------------------------------------------------------------------
def prepare_params(w, b, *, param_dtype=jnp.bfloat16, max_tk=2048,
                   vmem_budget=None, force_ktiled=False):
    w = jnp.asarray(w)
    b = jnp.asarray(b)
    n_classes, in_features = w.shape
    n_pad = _round_up(n_classes, 128)                     # lane-dense class dim
    budget = _vmem_budget_bytes() if vmem_budget is None else int(vmem_budget)
    w_item = jnp.dtype(param_dtype).itemsize

    # Fast path: whole pre-transposed weight slab stays VMEM-resident
    # (leave at least half the budget for activation tiles / outputs).
    resident = (not force_ktiled) and (2 * in_features * n_pad * w_item <= budget // 2)

    if resident:
        d_pad, tk = in_features, in_features
    else:
        tk = _largest_dividing_tile(in_features, max_tk)
        if tk:
            d_pad = in_features                            # no activation padding needed
        else:
            # Rare: in_features not a multiple of 128 AND weight too big for VMEM;
            # accept a one-time activation pad in predict().
            d_pad = _round_up(in_features, 128)
            tk = _largest_dividing_tile(d_pad, max_tk)

    w_t = jnp.zeros((d_pad, n_pad), param_dtype)
    w_t = w_t.at[:in_features, :n_classes].set(w.astype(param_dtype).T)
    b_p = jnp.full((1, n_pad), _NEG_BIG, jnp.float32)
    b_p = b_p.at[0, :n_classes].set(b.astype(jnp.float32))
    return {"w_t": w_t, "b": b_p, "num_classes": n_classes,
            "in_features": in_features, "n_pad": n_pad, "d_pad": d_pad,
            "tk": tk, "resident": resident, "vmem_budget": budget}


# ----------------------------------------------------------------------------
# BaseModel.predict -> (predicted_classes, max_probabilities) [, logits]
# ----------------------------------------------------------------------------
def predict(x_nchw, params, *, return_logits=False):
    w_t, b_p = params["w_t"], params["b"]
    n_classes, in_features = params["num_classes"], params["in_features"]
    n_pad, d_pad, tk = params["n_pad"], params["d_pad"], params["tk"]
    resident, budget = params["resident"], params["vmem_budget"]

    B = x_nchw.shape[0]
    x = jnp.reshape(x_nchw, (B, -1))          # == nn.Flatten(); no data movement
    if d_pad != in_features:
        # Rare ragged-K fallback only; one-time pad of the activations.
        x = jnp.zeros((B, d_pad), x.dtype).at[:, :in_features].set(x)
    x_item = jnp.dtype(x.dtype).itemsize
    w_item = jnp.dtype(w_t.dtype).itemsize

    # Sublane alignment for the activation dtype (8 for f32, 16 for bf16, ...).
    align = 8 * max(1, 4 // x_item)
    if B < align:
        # Tiny batch: pad a handful of rows so one full block covers it.
        x = jnp.zeros((align, x.shape[1]), x.dtype).at[:B, :].set(x)
    nrows = x.shape[0]

    # Batch tile: up to 512 rows; split into >= 2 blocks whenever possible so
    # both v7x TensorCores get work (no-op cost on single-TC v5e/v6e).
    if nrows >= 2 * align:
        tm = _round_up(_cdiv(nrows, 2), align)
    else:
        tm = align
    tm = max(align, min(tm, 512))

    want_logits = return_logits or (not resident)

    def vmem_est(tm_):
        if resident:
            fixed = w_t.size * w_item + n_pad * 4
            per_row = d_pad * x_item + 128 * 4 + (n_pad * 4 if want_logits else 0)
        else:
            fixed = tk * n_pad * w_item + n_pad * 4
            per_row = tk * x_item + 128 * 4 + n_pad * 4
        return 2 * (fixed + tm_ * per_row) + (2 << 20)

    while tm > align and vmem_est(tm) > budget:
        tm = max(align, _round_up(tm // 2, align))

    n_blocks = _cdiv(nrows, tm)
    b_pad = n_blocks * tm                     # only the tiny outputs carry pad rows

    if resident:
        grid = (n_blocks,)
        in_specs = [
            pl.BlockSpec((tm, d_pad), lambda i: (i, 0)),       # activations (streamed)
            pl.BlockSpec((d_pad, n_pad), lambda i: (0, 0)),    # weight (VMEM-resident)
            pl.BlockSpec((1, n_pad), lambda i: (0, 0)),        # bias
        ]
        out_shape = [jax.ShapeDtypeStruct((b_pad, 128), jnp.float32)]
        out_specs = [pl.BlockSpec((tm, 128), lambda i: (i, 0))]
        if want_logits:
            out_shape.append(jax.ShapeDtypeStruct((b_pad, n_pad), jnp.float32))
            out_specs.append(pl.BlockSpec((tm, n_pad), lambda i: (i, 0)))
            kernel = _resident_kernel_with_logits
        else:
            kernel = _resident_kernel
        dims = ("parallel",)
    else:
        grid = (n_blocks, d_pad // tk)                         # K last (reduction)
        in_specs = [
            pl.BlockSpec((tm, tk), lambda i, k: (i, k)),       # activations
            pl.BlockSpec((tk, n_pad), lambda i, k: (k, 0)),    # weight (pre-T)
            pl.BlockSpec((1, n_pad), lambda i, k: (0, 0)),     # bias
        ]
        out_shape = [jax.ShapeDtypeStruct((b_pad, 128), jnp.float32),
                     jax.ShapeDtypeStruct((b_pad, n_pad), jnp.float32)]
        out_specs = [pl.BlockSpec((tm, 128), lambda i, k: (i, 0)),
                     pl.BlockSpec((tm, n_pad), lambda i, k: (i, 0))]
        kernel = _ktiled_kernel
        dims = ("parallel", "arbitrary")

    outs = pl.pallas_call(
        kernel,
        out_shape=tuple(out_shape),
        grid_spec=pltpu.PrefetchScalarGridSpec(
            num_scalar_prefetch=0,
            grid=grid,
            in_specs=in_specs,
            out_specs=tuple(out_specs),
        ),
        compiler_params=pltpu.CompilerParams(
            dimension_semantics=dims,
            vmem_limit_bytes=int(budget),
        ),
    )(x, w_t, b_p)

    slab = outs[0]
    pred = slab[:B, 0].astype(jnp.int32)      # torch returns shape-(B,) tensors
    prob = slab[:B, 1]
    if return_logits:
        logits = outs[1][:B, :n_classes]
        return pred, prob, logits
    return pred, prob


def forward(x_nchw, params):
    """BaseModel.forward: Flatten + Linear (returns the logits)."""
    return predict(x_nchw, params, return_logits=True)[2]


# ----------------------------------------------------------------------------
# Deterministic synthetic init (nn.Linear default-init style; no checkpoint)
# ----------------------------------------------------------------------------
def init_raw_params(key, in_features, num_classes):
    kw, kb = jax.random.split(key)
    bound = 1.0 / (in_features ** 0.5)
    w = jax.random.uniform(kw, (num_classes, in_features), jnp.float32, -bound, bound)
    b = jax.random.uniform(kb, (num_classes,), jnp.float32, -bound, bound)
    return w, b


# TODO(synk): load_model()/models()/get_layer()/set_layer() are nn.Module
# introspection plumbing with no Pallas equivalent; only forward/predict are kernels.

if __name__ == "__main__":
    B, C, H, W = 2, 4, 16, 16
    NUM_CLASSES = 10
    D = C * H * W

    key = jax.random.PRNGKey(0)
    kx, kp, kx2 = jax.random.split(key, 3)
    x = jax.random.normal(kx, (B, C, H, W), jnp.float32)
    w, b = init_raw_params(kp, D, NUM_CLASSES)

    # Reference applies the same bf16 rounding to the operands (f32 accumulation)
    # so the comparison isolates kernel correctness from bf16 quantization.
    def ref_predict(x_in):
        xb = x_in.reshape(x_in.shape[0], D).astype(jnp.bfloat16)
        lg = jnp.dot(xb, w.T.astype(jnp.bfloat16),
                     preferred_element_type=jnp.float32) + b
        pr = jax.nn.softmax(lg, axis=1)
        return lg, jnp.argmax(lg, axis=1).astype(jnp.int32), jnp.max(pr, axis=1)

    # --- main path: bf16 weight, fully VMEM-resident, single fused call -------
    params = prepare_params(w, b)
    pred, prob, logits = predict(x, params, return_logits=True)
    jax.block_until_ready((pred, prob, logits))

    ref_logits, ref_pred, ref_prob = ref_predict(x)
    assert jnp.allclose(logits, ref_logits, atol=2e-3, rtol=2e-3), "logits mismatch"
    assert jnp.array_equal(pred, ref_pred), "argmax mismatch"
    assert jnp.allclose(prob, ref_prob, atol=1e-3, rtol=1e-3), "max prob mismatch"

    # forward() path (logits only)
    fwd = forward(x, params)
    assert jnp.allclose(fwd, ref_logits, atol=2e-3, rtol=2e-3), "forward mismatch"

    # --- K-tiled fallback + ragged batch tail (partial edge batch block) ------
    B2 = 37
    x2 = jax.random.normal(kx2, (B2, C, H, W), jnp.float32)
    params_kt = prepare_params(w, b, force_ktiled=True, max_tk=256)
    pred2, prob2 = predict(x2, params_kt)
    jax.block_until_ready((pred2, prob2))
    _, ref_pred2, ref_prob2 = ref_predict(x2)
    assert jnp.array_equal(pred2, ref_pred2), "k-tiled argmax mismatch"
    assert jnp.allclose(prob2, ref_prob2, atol=1e-3, rtol=1e-3), "k-tiled prob mismatch"

    print("KERNEL_OK")
</pallas_src>

<mosaic_0001>
module attributes {stable_mosaic.version = 11 : i64} {
  func.func @_resident_kernel_with_logits(%arg0: i32, %arg1: memref<8x1024xf32, #tpu.memory_space<vmem>>, %arg2: memref<1024x128xbf16, #tpu.memory_space<vmem>>, %arg3: memref<1x128xf32, #tpu.memory_space<vmem>>, %arg4: memref<8x128xf32, #tpu.memory_space<vmem>>, %arg5: memref<8x128xf32, #tpu.memory_space<vmem>>) attributes {dimension_semantics = [#tpu.dimension_semantics<parallel>], iteration_bounds = array<i64: 1>, scalar_prefetch = 0 : i64, scratch_operands = 0 : i64, tpu.core_type = #tpu.core_type<tc>, window_params = [{transform_indices = @transform_0, window_bounds = array<i64: 8, 1024>}, {pipeline_mode = #tpu.pipeline_mode<synchronous>, transform_indices = @transform_1, window_bounds = array<i64: 1024, 128>}, {pipeline_mode = #tpu.pipeline_mode<synchronous>, transform_indices = @transform_2, window_bounds = array<i64: 1, 128>}, {transform_indices = @transform_3, window_bounds = array<i64: 8, 128>}, {transform_indices = @transform_4, window_bounds = array<i64: 8, 128>}]} {
    %c0 = arith.constant 0 : index
    %c0_0 = arith.constant 0 : index
    %0 = vector.load %arg1[%c0, %c0_0] : memref<8x1024xf32, #tpu.memory_space<vmem>>, vector<8x1024xf32>
    %1 = arith.truncf %0 : vector<8x1024xf32> to vector<8x1024xbf16>
    %c0_1 = arith.constant 0 : index
    %c0_2 = arith.constant 0 : index
    %2 = vector.load %arg2[%c0_1, %c0_2] : memref<1024x128xbf16, #tpu.memory_space<vmem>>, vector<1024x128xbf16>
    %cst = arith.constant dense<0.000000e+00> : vector<8x128xf32>
    %3 = tpu.matmul %1, %2, %cst {dimension_numbers = #tpu.dot_dimension_numbers<[1], [0], [0], [1], [0, 0, 1, 1], [], []>} : vector<8x1024xbf16>, vector<1024x128xbf16>, vector<8x128xf32> -> vector<8x128xf32>
    %c0_3 = arith.constant 0 : index
    %c0_4 = arith.constant 0 : index
    %4 = vector.load %arg3[%c0_3, %c0_4] : memref<1x128xf32, #tpu.memory_space<vmem>>, vector<1x128xf32>
    %5 = vector.broadcast %4 : vector<1x128xf32> to vector<8x128xf32>
    %6 = arith.addf %3, %5 : vector<8x128xf32>
    %c0_5 = arith.constant 0 : index
    %c0_6 = arith.constant 0 : index
    %7 = vector.load %arg5[%c0_5, %c0_6] : memref<8x128xf32, #tpu.memory_space<vmem>>, vector<8x128xf32>
    tpu.vector_store %arg5[%c0_5, %c0_6], %6 {strides = array<i32>} : memref<8x128xf32, #tpu.memory_space<vmem>>, vector<8x128xf32>,
    %cst_7 = arith.constant dense<0xFF800000> : vector<8xf32>
    %8 = vector.multi_reduction <maximumf>, %6, %cst_7 [1] : vector<8x128xf32> to vector<8xf32>
    %9 = vector.shape_cast %8 : vector<8xf32> to vector<8x1xf32>
    %10 = vector.broadcast %9 : vector<8x1xf32> to vector<8x128xf32>
    %11 = arith.subf %6, %10 : vector<8x128xf32>
    %12 = math.exp %11 : vector<8x128xf32>
    %cst_8 = arith.constant dense<0.000000e+00> : vector<8xf32>
    %13 = vector.multi_reduction <add>, %12, %cst_8 [1] : vector<8x128xf32> to vector<8xf32>
    %14 = vector.shape_cast %13 : vector<8xf32> to vector<8x1xf32>
    %cst_9 = arith.constant 1.000000e+00 : f32
    %15 = vector.broadcast %cst_9 : f32 to vector<8x1xf32>
    %16 = arith.divf %15, %14 : vector<8x1xf32>
    %17 = tpu.iota {dimensions = array<i32: 1>} : vector<8x128xi32>
    %18 = vector.broadcast %9 : vector<8x1xf32> to vector<8x128xf32>
    %19 = arith.cmpf oeq, %6, %18 : vector<8x128xf32>
    %c128_i32 = arith.constant 128 : i32
    %20 = vector.broadcast %c128_i32 : i32 to vector<8x128xi32>
    %21 = arith.select %19, %17, %20 : vector<8x128xi1>, vector<8x128xi32>
    %cst_10 = arith.constant dense<2147483647> : vector<8xi32>
    %22 = vector.multi_reduction <minsi>, %21, %cst_10 [1] : vector<8x128xi32> to vector<8xi32>
    %23 = vector.shape_cast %22 : vector<8xi32> to vector<8x1xi32>
    %24 = arith.sitofp %23 : vector<8x1xi32> to vector<8x1xf32>
    %25 = tpu.iota {dimensions = array<i32: 1>} : vector<8x128xi32>
    %c0_i32 = arith.constant 0 : i32
    %26 = vector.broadcast %c0_i32 : i32 to vector<8x128xi32>
    %27 = arith.cmpi eq, %25, %26 : vector<8x128xi32>
    %c1_i32 = arith.constant 1 : i32
    %28 = vector.broadcast %c1_i32 : i32 to vector<8x128xi32>
    %29 = arith.cmpi eq, %25, %28 : vector<8x128xi32>
    %cst_11 = arith.constant 0.000000e+00 : f32
    %30 = vector.shape_cast %16 : vector<8x1xf32> to vector<8x1xf32>
    %31 = vector.broadcast %30 : vector<8x1xf32> to vector<8x128xf32>
    %32 = vector.broadcast %cst_11 : f32 to vector<8x128xf32>
    %33 = arith.select %29, %31, %32 : vector<8x128xi1>, vector<8x128xf32>
    %34 = vector.shape_cast %24 : vector<8x1xf32> to vector<8x1xf32>
    %35 = vector.broadcast %34 : vector<8x1xf32> to vector<8x128xf32>
    %36 = arith.select %27, %35, %33 : vector<8x128xi1>, vector<8x128xf32>
    %c0_12 = arith.constant 0 : index
    %c0_13 = arith.constant 0 : index
    %37 = vector.load %arg4[%c0_12, %c0_13] : memref<8x128xf32, #tpu.memory_space<vmem>>, vector<8x128xf32>
    tpu.vector_store %arg4[%c0_12, %c0_13], %36 {strides = array<i32>} : memref<8x128xf32, #tpu.memory_space<vmem>>, vector<8x128xf32>,
    return
  }
  func.func @transform_0(%arg0: i32) -> (i32, i32) {
    %c0_i32 = arith.constant 0 : i32
    %c0_i32_0 = arith.constant 0 : i32
    return %arg0, %c0_i32 : i32, i32
  }
  func.func @transform_1(%arg0: i32) -> (i32, i32) {
    %c0_i32 = arith.constant 0 : i32
    %c0_i32_0 = arith.constant 0 : i32
    %c0_i32_1 = arith.constant 0 : i32
    return %c0_i32, %c0_i32_0 : i32, i32
  }
  func.func @transform_2(%arg0: i32) -> (i32, i32) {
    %c0_i32 = arith.constant 0 : i32
    %c0_i32_0 = arith.constant 0 : i32
    %c0_i32_1 = arith.constant 0 : i32
    return %c0_i32, %c0_i32_0 : i32, i32
  }
  func.func @transform_3(%arg0: i32) -> (i32, i32) {
    %c0_i32 = arith.constant 0 : i32
    %c0_i32_0 = arith.constant 0 : i32
    return %arg0, %c0_i32 : i32, i32
  }
  func.func @transform_4(%arg0: i32) -> (i32, i32) {
    %c0_i32 = arith.constant 0 : i32
    %c0_i32_0 = arith.constant 0 : i32
    return %arg0, %c0_i32 : i32, i32
  }
}

</mosaic_0001>

<bundles_post_ra>
// kernel: tpu_custom_call.1
= control target key start
LH: loop header
LB: loop body
LE: loop exit
PB: predicated region body
PF: predicated region fallthrough
CT: control target
= control target key end

     0   :  { %10 = vsyncpa [#allocation3], 0  ;;  %s1216_s0 = inlined_call_operand.hbm [shape: f32[8,1024], index: 0, kind: input, shape index: {}]   ;;  %s1217_s1 = inlined_call_operand.hbm [shape: bf16[1024,128], index: 1, kind: input, shape index: {}]   ;;  %s1218_s2 = inlined_call_operand.vmem [shape: f32[1,128], index: 2, kind: input, shape index: {}]   ;;  %s1219_s3 = inlined_call_operand.hbm [shape: f32[8,128], index: 3, kind: output, shape index: {0}]   ;;  %s1220_s4 = inlined_call_operand.hbm [shape: f32[8,128], index: 4, kind: output, shape index: {1}]  }
   0x1   :  { %11 = vsyncpa [#allocation6], 0 }
   0x2   :  { %12 = vsyncpa [#allocation4], 0 }
   0x3   :  { %13 = vsyncpa [#allocation9], 0  ;;  %s1127_s15 = smov [#allocation2]   ;;  %s1128_s17 = smov [#allocation5]  }
   0x4   :  { %s20_s16 = sshll.u32 %s1127_s15, 4  ;;  %s29_s18 = sshll.u32 %s1128_s17, 4  ;;  %s21_s16 = int_to_ptr.vmem [resolvable:$true] %s20_s16  ;;  %s1158_s18 = int_to_ptr.vmem [resolvable:$true] %s29_s18 }
   0x5   :  { %s1031_s21 = scalar_lea.hbm %s1216_s0, 1024 }
   0x6   :  { %p1032_p0 = scmp.ne.s32.totalorder %s1216_s0, %s1031_s21  ;;  %p1035_p1 = scmp.lt.u32.totalorder %s1031_s21, %s1216_s0 }
   0x8   :  { %p1037_p2 = pnand %p1035_p1, %p1032_p0 }
   0xa   :  { %1040 = shalt.err (!%p1037_p2)
}
   0xb   :  { %s1041_s26 = scalar_lea.vmem %s21_s16, 1024  ;;  %p1046_p4 = scmp.lt.s32.totalorder %s21_s16, %s21_s16 }
   0xc   :  { %p1042_p3 = scmp.ne.s32.totalorder %s21_s16, %s1041_s26  ;;  %p1047_p5 = scmp.lt.s32.totalorder %s1041_s26, %s1041_s26 }
   0xe   :  { %p1048_p6 = por %p1047_p5, %p1046_p4 }
  0x10   :  { %p1049_p7 = pnand %p1048_p6, %p1042_p3 }
  0x12   :  { %1052 = shalt.err (!%p1049_p7)
}
  0x13   :  { %23 = dma.hbm_to_vmem [thread:$0]  %s1216_s0, 1024, %s21_s16, [#allocation3]  }
  0x14   :  { %s1053_s5 = scalar_lea.hbm %s1217_s1, 8192 }
  0x15   :  { %p1054_p8 = scmp.ne.s32.totalorder %s1217_s1, %s1053_s5  ;;  %p1057_p9 = scmp.lt.u32.totalorder %s1053_s5, %s1217_s1 }
  0x17   :  { %p1059_p10 = pnand %p1057_p9, %p1054_p8 }
  0x19   :  { %1062 = shalt.err (!%p1059_p10)
}
  0x1a   :  { %s1063_s10 = scalar_lea.vmem %s1158_s18, 8192  ;;  %p1068_p12 = scmp.lt.s32.totalorder %s1158_s18, %s1158_s18 }
  0x1b   :  { %p1064_p11 = scmp.ne.s32.totalorder %s1158_s18, %s1063_s10  ;;  %p1069_p13 = scmp.lt.s32.totalorder %s1063_s10, %s1063_s10 }
  0x1d   :  { %p1070_p0 = por %p1069_p13, %p1068_p12 }
  0x1f   :  { %p1071_p1 = pnand %p1070_p0, %p1064_p11 }
  0x21   :  { %1074 = shalt.err (!%p1071_p1)
}
  0x22   :  { %s1129_s0 = smov 64   ;;  %s1130_s11 = smov 4  }
  0x23   :  { %35 = dma.hbm_to_vmem [thread:$0]  %s1217_s1, 8192, %s1158_s18, [#allocation6], %s1129_s0, %s1129_s0, %s1130_s11  }
  0x24   :  { %1119 = dma.done.wait [#allocation3], 1024  }
  0x25   :  { %1120 = vsyncadd [#allocation3], 4294966272 }
  0x26   :  { %1121 = dma.done.wait [#allocation6], 8192  }
  0x27   :  { %1122 = vsyncadd [#allocation6], 4294959104  ;;  %v963_v0 = vld [vmem:[#allocation5 + $0x40] sm:$0xff]   ;;  %v967_v4 = vld [vmem:[#allocation5 + $0x48] sm:$0xff]  }
  0x28   :  { %v964_v1 = vld [vmem:[#allocation5 + $0xc0] sm:$0xff]   ;;  %869 = vmatprep.subr.bf16.mxu0 %v963_v0  ;;  %v968_v5 = vld [vmem:[#allocation5 + $0xc8] sm:$0xff]   ;;  %v971_v8 = vld [vmem:[#allocation5 + $0x50] sm:$0xff]  }
  0x29   :  { %v965_v2 = vld [vmem:[#allocation5] sm:$0xff]   ;;  %891 = vmatprep.subr.bf16.mxu1 %v964_v1  ;;  %v969_v6 = vld [vmem:[#allocation5 + $0x8] sm:$0xff]   ;;  %v972_v9 = vld [vmem:[#allocation5 + $0xd0] sm:$0xff]  }
  0x2a   :  { %v966_v3 = vld [vmem:[#allocation5 + $0x80] sm:$0xff]   ;;  %870 = vmatpush3.bf16.msra.mxu0 %v965_v2  ;;  %v970_v7 = vld [vmem:[#allocation5 + $0x88] sm:$0xff]   ;;  %v973_v10 = vld [vmem:[#allocation5 + $0x10] sm:$0xff]  }
  0x2b   :  { %892 = vmatpush3.bf16.msra.mxu1 %v966_v3  ;;  %871 = vmatprep.subr.bf16.mxu0 %v967_v4  ;;  %v974_v11 = vld [vmem:[#allocation5 + $0x90] sm:$0xff]   ;;  %v975_v12 = vld [vmem:[#allocation5 + $0x58] sm:$0xff]   ;;  %v979_v16 = vld [vmem:[#allocation5 + $0x60] sm:$0xff]  }
  0x2c   :  { %893 = vmatprep.subr.bf16.mxu1 %v968_v5  ;;  %v976_v13 = vld [vmem:[#allocation5 + $0xd8] sm:$0xff]   ;;  %v980_v17 = vld [vmem:[#allocation5 + $0xe0] sm:$0xff]   ;;  %v983_v20 = vld [vmem:[#allocation5 + $0x68] sm:$0xff]  }
  0x2d   :  { %v977_v14 = vld [vmem:[#allocation5 + $0x18] sm:$0xff]   ;;  %v981_v18 = vld [vmem:[#allocation5 + $0x20] sm:$0xff]   ;;  %v984_v21 = vld [vmem:[#allocation5 + $0xe8] sm:$0xff]  }
  0x2e   :  { %872 = vmatpush3.bf16.msra.mxu0 %v969_v6  ;;  %v978_v15 = vld [vmem:[#allocation5 + $0x98] sm:$0xff]   ;;  %v982_v19 = vld [vmem:[#allocation5 + $0xa0] sm:$0xff]   ;;  %v985_v22 = vld [vmem:[#allocation5 + $0x28] sm:$0xff]  }
  0x2f   :  { %894 = vmatpush3.bf16.msra.mxu1 %v970_v7  ;;  %873 = vmatprep.subr.bf16.mxu0 %v971_v8  ;;  %v986_v23 = vld [vmem:[#allocation5 + $0xa8] sm:$0xff]   ;;  %v987_v24 = vld [vmem:[#allocation5 + $0x70] sm:$0xff]   ;;  %v991_v28 = vld [vmem:[#allocation5 + $0x78] sm:$0xff]  }
  0x30   :  { %895 = vmatprep.subr.bf16.mxu1 %v972_v9  ;;  %v988_v25 = vld [vmem:[#allocation5 + $0xf0] sm:$0xff]   ;;  %v992_v29 = vld [vmem:[#allocation5 + $0xf8] sm:$0xff]   ;;  %v46_v32 = vld [vmem:[#allocation2 + $0x8] sm:$0xff] }
  0x31   :  { %v989_v26 = vld [vmem:[#allocation5 + $0x30] sm:$0xff]   ;;  %v993_v30 = vld [vmem:[#allocation5 + $0x38] sm:$0xff]   ;;  %v45_v34 = vld [vmem:[#allocation2] sm:$0xff]  ;;  %v54_v35 = vpack.c.bf16 %v46_v32, %v46_v32 }
  0x32   :  { %874 = vmatpush3.bf16.msra.mxu0 %v973_v10  ;;  %v990_v27 = vld [vmem:[#allocation5 + $0xb0] sm:$0xff]   ;;  %v994_v31 = vld [vmem:[#allocation5 + $0xb8] sm:$0xff]   ;;  %v53_v37 = vpack.c.bf16 %v45_v34, %v45_v34  ;;  %v995_v40 = vld [vmem:[#allocation5 + $0x140] sm:$0xff]  }
  0x33   :  { %896 = vmatpush3.bf16.msra.mxu1 %v974_v11  ;;  %875 = vmatprep.subr.bf16.mxu0 %v975_v12  ;;  %v48_v33 = vld [vmem:[#allocation2 + $0x18] sm:$0xff]  ;;  %v47_v38 = vld [vmem:[#allocation2 + $0x10] sm:$0xff]  ;;  %v996_v41 = vld [vmem:[#allocation5 + $0x1c0] sm:$0xff]  }
  0x34   :  { %897 = vmatprep.subr.bf16.mxu1 %v976_v13  ;;  %v56_v36 = vpack.c.bf16 %v48_v33, %v48_v33  ;;  %v55_v39 = vpack.c.bf16 %v47_v38, %v47_v38  ;;  %612 = vmatprep.mubr.bf16.mxu0 %v54_v35  ;;  %v997_v42 = vld [vmem:[#allocation5 + $0x100] sm:$0xff]   ;;  %v999_v44 = vld [vmem:[#allocation5 + $0x148] sm:$0xff]   ;;  %v1003_v48 = vld [vmem:[#allocation5 + $0x150] sm:$0xff]  }
  0x35   :  { %v998_v43 = vld [vmem:[#allocation5 + $0x180] sm:$0xff]   ;;  %v1000_v45 = vld [vmem:[#allocation5 + $0x1c8] sm:$0xff]   ;;  %v1004_v49 = vld [vmem:[#allocation5 + $0x1d0] sm:$0xff]  }
  0x36   :  { %876 = vmatpush3.bf16.msra.mxu0 %v977_v14  ;;  %652 = vmatprep.mubr.bf16.mxu1 %v56_v36  ;;  %v1001_v46 = vld [vmem:[#allocation5 + $0x108] sm:$0xff]   ;;  %v1005_v50 = vld [vmem:[#allocation5 + $0x110] sm:$0xff]   ;;  %v1007_v52 = vld [vmem:[#allocation5 + $0x158] sm:$0xff]  }
  0x37   :  { %898 = vmatpush3.bf16.msra.mxu1 %v978_v15  ;;  %877 = vmatprep.subr.bf16.mxu0 %v979_v16  ;;  %v1002_v47 = vld [vmem:[#allocation5 + $0x188] sm:$0xff]   ;;  %v1006_v51 = vld [vmem:[#allocation5 + $0x190] sm:$0xff]   ;;  %v1008_v53 = vld [vmem:[#allocation5 + $0x1d8] sm:$0xff]  }
  0x38   :  { %899 = vmatprep.subr.bf16.mxu1 %v980_v17  ;;  %v1009_v54 = vld [vmem:[#allocation5 + $0x118] sm:$0xff]   ;;  %v1011_v56 = vld [vmem:[#allocation5 + $0x160] sm:$0xff]   ;;  %v1015_v60 = vld [vmem:[#allocation5 + $0x168] sm:$0xff]  }
  0x39   :  { %v1010_v55 = vld [vmem:[#allocation5 + $0x198] sm:$0xff]   ;;  %v1012_v57 = vld [vmem:[#allocation5 + $0x1e0] sm:$0xff]   ;;  %v1016_v61 = vld [vmem:[#allocation5 + $0x1e8] sm:$0xff]  }
  0x3a   :  { %878 = vmatpush3.bf16.msra.mxu0 %v981_v18  ;;  %v1013_v58 = vld [vmem:[#allocation5 + $0x120] sm:$0xff]   ;;  %v1017_v62 = vld [vmem:[#allocation5 + $0x128] sm:$0xff]   ;;  %v1019_v0 = vld [vmem:[#allocation5 + $0x170] sm:$0xff]  }
  0x3b   :  { %900 = vmatpush3.bf16.msra.mxu1 %v982_v19  ;;  %879 = vmatprep.subr.bf16.mxu0 %v983_v20  ;;  %v1014_v59 = vld [vmem:[#allocation5 + $0x1a0] sm:$0xff]   ;;  %v1018_v63 = vld [vmem:[#allocation5 + $0x1a8] sm:$0xff]   ;;  %v1020_v1 = vld [vmem:[#allocation5 + $0x1f0] sm:$0xff]  }
  0x3c   :  { %901 = vmatprep.subr.bf16.mxu1 %v984_v21  ;;  %v1021_v2 = vld [vmem:[#allocation5 + $0x130] sm:$0xff]   ;;  %v1023_v4 = vld [vmem:[#allocation5 + $0x178] sm:$0xff]   ;;  %v50_v8 = vld [vmem:[#allocation2 + $0x28] sm:$0xff] }
  0x3d   :  { %v1022_v3 = vld [vmem:[#allocation5 + $0x1b0] sm:$0xff]   ;;  %v1024_v5 = vld [vmem:[#allocation5 + $0x1f8] sm:$0xff]   ;;  %v58_v10 = vpack.c.bf16 %v50_v8, %v50_v8  ;;  %v49_v12 = vld [vmem:[#allocation2 + $0x20] sm:$0xff] }
  0x3e   :  { %880 = vmatpush3.bf16.msra.mxu0 %v985_v22  ;;  %v1025_v6 = vld [vmem:[#allocation5 + $0x138] sm:$0xff]   ;;  %v51_v13 = vld [vmem:[#allocation2 + $0x30] sm:$0xff]  ;;  %v57_v14 = vpack.c.bf16 %v49_v12, %v49_v12  ;;  %v804_v18 = vld [vmem:[%s1218_s2] ss:$0 sm:$0xff]  ;;  %s1131_s2 = smov [#allocation8]  }
  0x3f   :  { %902 = vmatpush3.bf16.msra.mxu1 %v986_v23  ;;  %881 = vmatprep.subr.bf16.mxu0 %v987_v24  ;;  %v1026_v7 = vld [vmem:[#allocation5 + $0x1b8] sm:$0xff]   ;;  %v59_v15 = vpack.c.bf16 %v51_v13, %v51_v13  ;;  %s790_s15 = sshll.u32 %s1131_s2, 4  ;;  %s791_s15 = int_to_ptr.vmem [resolvable:$true] %s790_s15 }
  0x40   :  { %903 = vmatprep.subr.bf16.mxu1 %v988_v25  ;;  %v52_v9 = vld [vmem:[#allocation2 + $0x38] sm:$0xff]  ;;  %s1075_s16 = scalar_lea.vmem %s791_s15, 128  ;;  %p1080_p3 = scmp.lt.s32.totalorder %s791_s15, %s791_s15 }
  0x41   :  { %v60_v11 = vpack.c.bf16 %v52_v9, %v52_v9  ;;  %p1076_p2 = scmp.ne.s32.totalorder %s791_s15, %s1075_s16  ;;  %p1081_p4 = scmp.lt.s32.totalorder %s1075_s16, %s1075_s16 }
  0x42   :  { %882 = vmatpush3.bf16.msra.mxu0 %v989_v26 }
  0x43   :  { %904 = vmatpush3.bf16.msra.mxu1 %v990_v27  ;;  %883 = vmatprep.subr.bf16.mxu0 %v991_v28  ;;  %p1082_p5 = por %p1081_p4, %p1080_p3 }
  0x44   :  { %905 = vmatprep.subr.bf16.mxu1 %v992_v29 }
  0x45   :  { %p1083_p6 = pnand %p1082_p5, %p1076_p2 }
  0x46   :  { %884 = vmatpush3.bf16.msra.mxu0 %v993_v30 }
  0x47   :  { %906 = vmatpush3.bf16.msra.mxu1 %v994_v31  ;;  %913 = vmatprep.subr.bf16.mxu0 %v995_v40 }
  0x48   :  { %935 = vmatprep.subr.bf16.mxu1 %v996_v41  ;;  %v750_v41 = vlaneseq }
  0x49   :  { %613 = vmatmul.mubr.bf16.vlgmr.msra.gmra.mrb[0].mxu0 %v53_v37 }
  0x4a   :  { %653 = vmatmul.mubr.bf16.vlgmr.msra.gmra.mrb[0].mxu1 %v55_v39  ;;  %914 = vmatpush3.bf16.msra.mxu0 %v997_v42  ;;  %v751_v42 = vand.u32 127, %v750_v41 }
  0x4b   :  { %936 = vmatpush3.bf16.msra.mxu1 %v998_v43  ;;  %915 = vmatprep.subr.bf16.mxu0 %v999_v44 }
  0x4c   :  { %937 = vmatprep.subr.bf16.mxu1 %v1000_v45  ;;  %692 = vmatprep.mubr.bf16.mxu0 %v58_v10 }
  0x4d   :  { %732 = vmatprep.mubr.bf16.mxu1 %v60_v11 }
  0x4e   :  { %916 = vmatpush3.bf16.msra.mxu0 %v1001_v46 }
  0x4f   :  { %938 = vmatpush3.bf16.msra.mxu1 %v1002_v47  ;;  %917 = vmatprep.subr.bf16.mxu0 %v1003_v48 }
  0x50   :  { %939 = vmatprep.subr.bf16.mxu1 %v1004_v49 }
  0x52   :  { %918 = vmatpush3.bf16.msra.mxu0 %v1005_v50 }
  0x53   :  { %940 = vmatpush3.bf16.msra.mxu1 %v1006_v51  ;;  %919 = vmatprep.subr.bf16.mxu0 %v1007_v52 }
  0x54   :  { %941 = vmatprep.subr.bf16.mxu1 %v1008_v53 }
  0x56   :  { %920 = vmatpush3.bf16.msra.mxu0 %v1009_v54 }
  0x57   :  { %942 = vmatpush3.bf16.msra.mxu1 %v1010_v55  ;;  %921 = vmatprep.subr.bf16.mxu0 %v1011_v56 }
  0x58   :  { %943 = vmatprep.subr.bf16.mxu1 %v1012_v57 }
  0x5a   :  { %922 = vmatpush3.bf16.msra.mxu0 %v1013_v58 }
  0x5b   :  { %944 = vmatpush3.bf16.msra.mxu1 %v1014_v59  ;;  %923 = vmatprep.subr.bf16.mxu0 %v1015_v60 }
  0x5c   :  { %945 = vmatprep.subr.bf16.mxu1 %v1016_v61 }
  0x5e   :  { %924 = vmatpush3.bf16.msra.mxu0 %v1017_v62 }
  0x5f   :  { %946 = vmatpush3.bf16.msra.mxu1 %v1018_v63  ;;  %925 = vmatprep.subr.bf16.mxu0 %v1019_v0 }
  0x60   :  { %947 = vmatprep.subr.bf16.mxu1 %v1020_v1 }
  0x62   :  { %926 = vmatpush3.bf16.msra.mxu0 %v1021_v2 }
  0x63   :  { %948 = vmatpush3.bf16.msra.mxu1 %v1022_v3  ;;  %927 = vmatprep.subr.bf16.mxu0 %v1023_v4 }
  0x64   :  { %949 = vmatprep.subr.bf16.mxu1 %v1024_v5 }
  0x66   :  { %928 = vmatpush3.bf16.msra.mxu0 %v1025_v6 }
  0x67   :  { %950 = vmatpush3.bf16.msra.mxu1 %v1026_v7 }
  0x69   :  { %693 = vmatmul.mubr.bf16.vlgmr.msra.gmra.mrb[4].mxu0 %v57_v14 }
  0x6a   :  { %733 = vmatmul.mubr.bf16.vlgmr.msra.gmra.mrb[4].mxu1 %v59_v15 }
 0x11c   :  { %v885_v16 = vpop.f32.mrb[0].mxu0 }
 0x11d   :  { %v907_v17 = vpop.f32.mrb[0].mxu1  ;;  %v886_v19 = vpop.f32.mrb[1].mxu0 }
 0x11e   :  { %v908_v20 = vpop.f32.mrb[1].mxu1  ;;  %v887_v21 = vadd.f32 %v886_v19, %v885_v16  ;;  %v888_v23 = vpop.f32.mrb[2].mxu0 }
 0x11f   :  { %v909_v22 = vadd.f32 %v908_v20, %v907_v17  ;;  %v910_v24 = vpop.f32.mrb[2].mxu1  ;;  %v889_v25 = vpop.f32.mrb[3].mxu0 }
 0x120   :  { %v911_v26 = vpop.f32.mrb[3].mxu1  ;;  %v615_v27 = vadd.f32 %v887_v21, %v804_v18 }
 0x122   :  { %v655_v28 = vadd.f32 %v909_v22, %v615_v27 }
 0x13c   :  { %v929_v29 = vpop.f32.mrb[4].mxu0 }
 0x13d   :  { %v951_v30 = vpop.f32.mrb[4].mxu1  ;;  %v930_v31 = vpop.f32.mrb[5].mxu0 }
 0x13e   :  { %v931_v32 = vadd.f32 %v930_v31, %v929_v29  ;;  %v952_v33 = vpop.f32.mrb[5].mxu1  ;;  %v932_v34 = vpop.f32.mrb[6].mxu0 }
 0x13f   :  { %v953_v35 = vadd.f32 %v952_v33, %v951_v30  ;;  %v954_v36 = vpop.f32.mrb[6].mxu1  ;;  %v933_v37 = vpop.f32.mrb[7].mxu0 }
 0x140   :  { %v695_v38 = vadd.f32 %v931_v32, %v655_v28  ;;  %v955_v39 = vpop.f32.mrb[7].mxu1 }
 0x142   :  { %v735_v40 = vadd.f32 %v953_v35, %v695_v38 }
 0x144   :  { %740 = vst [vmem:[#allocation8] sm:$0xff] %v735_v40  ;;  %741 = vmax.xlane.f32.xlu0 %v735_v40 }
 0x1d1   :  { %v742_v43 = vpop.xlane.xlu0 %741 }
 0x1d2   :  { %v743_v44 = vsub.f32 %v735_v40, %v742_v43  ;;  %vm752_vm0 = vcmp.eq.f32.partialorder %v735_v40, %v742_v43 }
 0x1d3   :  { %v753_v45 = vsel %vm752_vm0, %v751_v42, 128 }
 0x1d4   :  { %v744_v46 = vmul.f32 1.442695, %v743_v44  ;;  %v755_v47 = vshra.s32 %v753_v45, 16  ;;  %v754_v50 = vand.u32 65535, %v753_v45 }
 0x1d6   :  { %v757_v48 = vcvt.s32.f32 %v755_v47  ;;  %1027 = vpow2.f32 %v744_v46  ;;  %v756_v52 = vcvt.s32.f32 %v754_v50 }
 0x1d8   :  { %758 = vmin.xlane.f32.xlu0 %v757_v48 }
 0x1e0   :  { %v1028_v49 = vpop.eup %1027 }
 0x1e1   :  { %746 = vadd.xlane.f32.xlu1 %v1028_v49 }
 0x265   :  { %v759_v51 = vpop.xlane.xlu0 %758 }
 0x266   :  { %vm760_vm1 = vcmp.eq.f32.partialorder %v757_v48, %v759_v51 }
 0x267   :  { %v761_v53 = vsel %vm760_vm1, %v756_v52, inf }
 0x268   :  { %762 = vmin.xlane.f32.xlu1 %v761_v53 }
 0x269   :  { %1086 = shalt.err (!%p1083_p6)
}
 0x26a   :  { %s1087_s19 = scalar_lea.hbm %s1220_s4, 128 }
 0x26b   :  { %p1088_p7 = scmp.ne.s32.totalorder %s1220_s4, %s1087_s19  ;;  %p1091_p8 = scmp.lt.u32.totalorder %s1087_s19, %s1220_s4 }
 0x26d   :  { %p1093_p9 = pnand %p1091_p8, %p1088_p7 }
 0x26f   :  { %1096 = shalt.err (!%p1093_p9)
}
 0x270   :  { %793 = dma.vmem_to_hbm [thread:$0]  %s791_s15, 128, %s1220_s4, [#allocation9]   ;;  %v747_v54 = vpop.xlane.xlu1 %746  ;;  %v765_v55 = vcvt.f32.s32 %v759_v51  ;;  %vm770_vm2 = vcmp.eq.s32.totalorder %v751_v42, 1  ;;  %vm769_vm3 = vcmp.eq.s32.totalorder %v751_v42, 0 }
 0x271   :  { %1029 = vrcp.f32 %v747_v54  ;;  %s1132_s26 = smov [#allocation7]  }
 0x272   :  { %v766_v57 = vshll.u32 %v765_v55, 16  ;;  %s780_s27 = sshll.u32 %s1132_s26, 4  ;;  %s781_s27 = int_to_ptr.vmem [resolvable:$true] %s780_s27 }
 0x273   :  { %s1097_s28 = scalar_lea.vmem %s781_s27, 128  ;;  %p1102_p11 = scmp.lt.s32.totalorder %s781_s27, %s781_s27 }
 0x274   :  { %p1098_p10 = scmp.ne.s32.totalorder %s781_s27, %s1097_s28  ;;  %p1103_p12 = scmp.lt.s32.totalorder %s1097_s28, %s1097_s28 }
 0x276   :  { %p1104_p13 = por %p1103_p12, %p1102_p11 }
 0x278   :  { %p1105_p0 = pnand %p1104_p13, %p1098_p10 }
 0x27b   :  { %v1030_v59 = vpop.eup %1029 }
 0x27c   :  { %v771_v62 = vsel %vm770_vm2, %v1030_v59, 0.0 }
 0x2f5   :  { %v763_v56 = vpop.xlane.xlu1 %762 }
 0x2f6   :  { %v764_v58 = vcvt.f32.s32 %v763_v56 }
 0x2f8   :  { %v767_v60 = vadd.s32 %v766_v57, %v764_v58 }
 0x2fa   :  { %v768_v61 = vcvt.s32.f32 %v767_v60 }
 0x2fc   :  { %v772_v63 = vsel %vm769_vm3, %v768_v61, %v771_v62 }
 0x2fd   :  { %773 = vst [vmem:[#allocation7] sm:$0xff] %v772_v63 }
 0x2fe   :  { %1108 = shalt.err (!%p1105_p0)
}
 0x2ff   :  { %s1109_s30 = scalar_lea.hbm %s1219_s3, 128 }
 0x300   :  { %p1110_p1 = scmp.ne.s32.totalorder %s1219_s3, %s1109_s30  ;;  %p1113_p2 = scmp.lt.u32.totalorder %s1109_s30, %s1219_s3 }
 0x302   :  { %p1115_p3 = pnand %p1113_p2, %p1110_p1 }
 0x304   :  { %1118 = shalt.err (!%p1115_p3)
}
 0x305   :  { %783 = dma.vmem_to_hbm [thread:$0]  %s781_s27, 128, %s1219_s3, [#allocation4]  }
 0x306   :  { %1123 = dma.done.wait [#allocation4], 128  }
 0x307   :  { %1124 = vsyncadd [#allocation4], 4294967168 }
 0x308   :  { %1125 = dma.done.wait [#allocation9], 128  }
 0x309   :  { %1126 = vsyncadd [#allocation9], 4294967168 }
 0x30a   :  { %800 = vsyncpa [#allocation3], 1 }
 0x30b   :  { %801 = vsyncpa [#allocation6], 1 }
 0x30c   :  { %802 = vsyncpa [#allocation4], 1 }
 0x30d   :  { %803 = vsyncpa [#allocation9], 1 }

</bundles_post_ra>
